<compile_context>
chip_gen: v6e
topology: v6e:2x2x1
jax: 0.10.0
libtpu: 0.0.40
codegen_flags: <defaults>
</compile_context>

<pallas_src>
from functools import partial

import jax
import jax.numpy as jnp
from jax.experimental import pallas as pl
from jax.experimental.pallas import tpu as pltpu

_SUBLANE = 8  # sublane width (second-to-last dim alignment for batch tiles)


def _round_up(x, m):
    return (x + m - 1) // m * m


def simplenet_kernel(x_ref, w1_ref, b1_ref, w2_ref, b2_ref, out_ref):
    # First linear: [TILE_B, D_in] @ [D_in, H], f32 accumulation on the MXU.
    h = jnp.dot(x_ref[...], w1_ref[...], preferred_element_type=jnp.float32)
    # Bias + ReLU epilogue in f32 (safe on v5e's no-bf16 VPU as well).
    h = jnp.maximum(h + b1_ref[...], 0.0)
    # Second linear: [TILE_B, H] @ [H, D_out].  If weights are bf16 (fast
    # path), the hidden activation is downcast to bf16 for the MXU feed.
    y = jnp.dot(h.astype(w2_ref.dtype), w2_ref[...],
                preferred_element_type=jnp.float32)
    out_ref[...] = (y + b2_ref[...]).astype(out_ref.dtype)


@partial(jax.jit, static_argnames=("tile_b", "use_bf16"))
def simplenet_forward(x, w1, b1, w2, b2, tile_b=None, use_bf16=False):
    """Fused Linear -> ReLU -> Linear.

    x:  [B, D_in]
    w1: [D_in, H]   (transposed vs. PyTorch's [out, in])
    b1: [1, H]
    w2: [H, D_out]
    b2: [1, D_out]
    Returns [B, D_out] float32.
    """
    B, D_in = x.shape
    H = w1.shape[1]
    D_out = w2.shape[1]

    # Batch tile: multiple of 8 sublanes, capped at 512 (larger M amortizes
    # per-step overhead and MXU weight pushes; per-step VMEM is trivially
    # small so no vmem_limit override is needed).
    if tile_b is None:
        tile_b = min(512, _round_up(B, _SUBLANE))
    tile_b = _round_up(tile_b, _SUBLANE)
    b_p = _round_up(B, tile_b)

    # Optional bf16 streaming path (halves activation HBM bytes, bf16 MXU).
    if use_bf16:
        x = x.astype(jnp.bfloat16)
        w1 = w1.astype(jnp.bfloat16)
        w2 = w2.astype(jnp.bfloat16)
    b1 = b1.astype(jnp.float32)
    b2 = b2.astype(jnp.float32)

    # Pad only the batch axis, and only when needed (zero rows are inert and
    # sliced off at the end).
    if b_p != B:
        x = jnp.zeros((b_p, D_in), x.dtype).at[:B].set(x)

    grid = (b_p // tile_b,)

    out = pl.pallas_call(
        simplenet_kernel,
        out_shape=jax.ShapeDtypeStruct((b_p, D_out), jnp.float32),
        grid_spec=pl.GridSpec(
            grid=grid,
            in_specs=[
                # Activations: tiled over batch (auto double-buffered).
                # Last dim D_in equals the full array dim -> legal block.
                pl.BlockSpec((tile_b, D_in), lambda i: (i, 0)),
                # Weights/biases: same block every step -> stay VMEM-resident,
                # no re-DMA across grid iterations.
                pl.BlockSpec((D_in, H), lambda i: (0, 0)),
                pl.BlockSpec((1, H), lambda i: (0, 0)),
                pl.BlockSpec((H, D_out), lambda i: (0, 0)),
                pl.BlockSpec((1, D_out), lambda i: (0, 0)),
            ],
            # Output written at its real width D_out (full array dim).
            out_specs=pl.BlockSpec((tile_b, D_out), lambda i: (i, 0)),
        ),
        compiler_params=pltpu.CompilerParams(
            # Batch tiles are independent -> shard across v7x's 2 TensorCores.
            dimension_semantics=("parallel",),
        ),
    )(x, w1, b1, w2, b2)

    if b_p != B:
        out = out[:B]
    return out


def init_params(key, input_dim, hidden_dim, output_dim):
    """Deterministic init mimicking nn.Linear's uniform(-1/sqrt(fan_in), 1/sqrt(fan_in))."""
    k1, k2, k3, k4 = jax.random.split(key, 4)
    bound1 = 1.0 / jnp.sqrt(input_dim)
    bound2 = 1.0 / jnp.sqrt(hidden_dim)
    # Stored pre-transposed: [in, out]
    w1 = jax.random.uniform(k1, (input_dim, hidden_dim), jnp.float32, -bound1, bound1)
    b1 = jax.random.uniform(k2, (1, hidden_dim), jnp.float32, -bound1, bound1)
    w2 = jax.random.uniform(k3, (hidden_dim, output_dim), jnp.float32, -bound2, bound2)
    b2 = jax.random.uniform(k4, (1, output_dim), jnp.float32, -bound2, bound2)
    return w1, b1, w2, b2


if __name__ == "__main__":
    input_dim, hidden_dim, output_dim = 32, 64, 16
    batch = 8

    key = jax.random.PRNGKey(0)
    k_x, k_p = jax.random.split(key)
    x = jax.random.normal(k_x, (batch, input_dim), jnp.float32)
    w1, b1, w2, b2 = init_params(k_p, input_dim, hidden_dim, output_dim)

    # Small batch, single grid step, f32 path (exact PyTorch semantics).
    y = simplenet_forward(x, w1, b1, w2, b2)
    jax.block_until_ready(y)

    h_ref = jnp.maximum(x @ w1 + b1, 0.0)
    y_ref = h_ref @ w2 + b2
    assert y.shape == (batch, output_dim)
    assert jnp.allclose(y, y_ref, atol=1e-5, rtol=1e-5)

    # Larger batch: multi-tile grid (>= 2 steps), exercises the batch-pad path
    # (1000 is deliberately not a multiple of the 512-row tile).
    big_batch = 1000
    xb = jax.random.normal(k_x, (big_batch, input_dim), jnp.float32)
    yb = simplenet_forward(xb, w1, b1, w2, b2)
    jax.block_until_ready(yb)
    yb_ref = jnp.maximum(xb @ w1 + b1, 0.0) @ w2 + b2
    assert yb.shape == (big_batch, output_dim)
    assert jnp.allclose(yb, yb_ref, atol=1e-4, rtol=1e-4)

    # bf16 streaming fast path (looser tolerance vs. the f32 reference).
    yb16 = simplenet_forward(xb, w1, b1, w2, b2, use_bf16=True)
    jax.block_until_ready(yb16)
    assert yb16.shape == (big_batch, output_dim)
    assert jnp.allclose(yb16, yb_ref, atol=1e-1, rtol=1e-1)

    print("KERNEL_OK")
</pallas_src>

<mosaic_0001>
module attributes {stable_mosaic.version = 11 : i64} {
  func.func @simplenet_kernel(%arg0: i32, %arg1: memref<8x32xf32, #tpu.memory_space<vmem>>, %arg2: memref<32x64xf32, #tpu.memory_space<vmem>>, %arg3: memref<1x64xf32, #tpu.memory_space<vmem>>, %arg4: memref<64x16xf32, #tpu.memory_space<vmem>>, %arg5: memref<1x16xf32, #tpu.memory_space<vmem>>, %arg6: memref<8x16xf32, #tpu.memory_space<vmem>>) attributes {dimension_semantics = [#tpu.dimension_semantics<parallel>], iteration_bounds = array<i64: 1>, scalar_prefetch = 0 : i64, scratch_operands = 0 : i64, tpu.core_type = #tpu.core_type<tc>, window_params = [{transform_indices = @transform_0, window_bounds = array<i64: 8, 32>}, {pipeline_mode = #tpu.pipeline_mode<synchronous>, transform_indices = @transform_1, window_bounds = array<i64: 32, 64>}, {pipeline_mode = #tpu.pipeline_mode<synchronous>, transform_indices = @transform_2, window_bounds = array<i64: 1, 64>}, {pipeline_mode = #tpu.pipeline_mode<synchronous>, transform_indices = @transform_3, window_bounds = array<i64: 64, 16>}, {pipeline_mode = #tpu.pipeline_mode<synchronous>, transform_indices = @transform_4, window_bounds = array<i64: 1, 16>}, {transform_indices = @transform_5, window_bounds = array<i64: 8, 16>}]} {
    %c0 = arith.constant 0 : index
    %c0_0 = arith.constant 0 : index
    %0 = vector.load %arg1[%c0, %c0_0] : memref<8x32xf32, #tpu.memory_space<vmem>>, vector<8x32xf32>
    %c0_1 = arith.constant 0 : index
    %c0_2 = arith.constant 0 : index
    %1 = vector.load %arg2[%c0_1, %c0_2] : memref<32x64xf32, #tpu.memory_space<vmem>>, vector<32x64xf32>
    %cst = arith.constant dense<0.000000e+00> : vector<8x64xf32>
    %2 = tpu.matmul %0, %1, %cst {dimension_numbers = #tpu.dot_dimension_numbers<[1], [0], [0], [1], [0, 0, 1, 1], [], []>} : vector<8x32xf32>, vector<32x64xf32>, vector<8x64xf32> -> vector<8x64xf32>
    %c0_3 = arith.constant 0 : index
    %c0_4 = arith.constant 0 : index
    %3 = vector.load %arg3[%c0_3, %c0_4] : memref<1x64xf32, #tpu.memory_space<vmem>>, vector<1x64xf32>
    %4 = vector.broadcast %3 : vector<1x64xf32> to vector<8x64xf32>
    %5 = arith.addf %2, %4 : vector<8x64xf32>
    %cst_5 = arith.constant 0.000000e+00 : f32
    %6 = vector.broadcast %cst_5 : f32 to vector<8x64xf32>
    %7 = arith.maximumf %5, %6 : vector<8x64xf32>
    %c0_6 = arith.constant 0 : index
    %c0_7 = arith.constant 0 : index
    %8 = vector.load %arg4[%c0_6, %c0_7] : memref<64x16xf32, #tpu.memory_space<vmem>>, vector<64x16xf32>
    %cst_8 = arith.constant dense<0.000000e+00> : vector<8x16xf32>
    %9 = tpu.matmul %7, %8, %cst_8 {dimension_numbers = #tpu.dot_dimension_numbers<[1], [0], [0], [1], [0, 0, 1, 1], [], []>} : vector<8x64xf32>, vector<64x16xf32>, vector<8x16xf32> -> vector<8x16xf32>
    %c0_9 = arith.constant 0 : index
    %c0_10 = arith.constant 0 : index
    %10 = vector.load %arg5[%c0_9, %c0_10] : memref<1x16xf32, #tpu.memory_space<vmem>>, vector<1x16xf32>
    %11 = vector.broadcast %10 : vector<1x16xf32> to vector<8x16xf32>
    %12 = arith.addf %9, %11 : vector<8x16xf32>
    %c0_11 = arith.constant 0 : index
    %c0_12 = arith.constant 0 : index
    %13 = vector.load %arg6[%c0_11, %c0_12] : memref<8x16xf32, #tpu.memory_space<vmem>>, vector<8x16xf32>
    tpu.vector_store %arg6[%c0_11, %c0_12], %12 {strides = array<i32>} : memref<8x16xf32, #tpu.memory_space<vmem>>, vector<8x16xf32>,
    return
  }
  func.func @transform_0(%arg0: i32) -> (i32, i32) {
    %c0_i32 = arith.constant 0 : i32
    %c0_i32_0 = arith.constant 0 : i32
    return %arg0, %c0_i32 : i32, i32
  }
  func.func @transform_1(%arg0: i32) -> (i32, i32) {
    %c0_i32 = arith.constant 0 : i32
    %c0_i32_0 = arith.constant 0 : i32
    %c0_i32_1 = arith.constant 0 : i32
    return %c0_i32, %c0_i32_0 : i32, i32
  }
  func.func @transform_2(%arg0: i32) -> (i32, i32) {
    %c0_i32 = arith.constant 0 : i32
    %c0_i32_0 = arith.constant 0 : i32
    %c0_i32_1 = arith.constant 0 : i32
    return %c0_i32, %c0_i32_0 : i32, i32
  }
  func.func @transform_3(%arg0: i32) -> (i32, i32) {
    %c0_i32 = arith.constant 0 : i32
    %c0_i32_0 = arith.constant 0 : i32
    %c0_i32_1 = arith.constant 0 : i32
    return %c0_i32, %c0_i32_0 : i32, i32
  }
  func.func @transform_4(%arg0: i32) -> (i32, i32) {
    %c0_i32 = arith.constant 0 : i32
    %c0_i32_0 = arith.constant 0 : i32
    %c0_i32_1 = arith.constant 0 : i32
    return %c0_i32, %c0_i32_0 : i32, i32
  }
  func.func @transform_5(%arg0: i32) -> (i32, i32) {
    %c0_i32 = arith.constant 0 : i32
    %c0_i32_0 = arith.constant 0 : i32
    return %arg0, %c0_i32 : i32, i32
  }
}

</mosaic_0001>

<bundles_post_ra>
// kernel: simplenet_forward.1
= control target key start
LH: loop header
LB: loop body
LE: loop exit
PB: predicated region body
PF: predicated region fallthrough
CT: control target
= control target key end

     0   :  { %v286_v1 = vmov 0.0   ;;  %vm287_vm0 = vmmov 0   ;;  %s369_s0 = inlined_call_operand.vmem [shape: f32[8,32], index: 0, kind: input, shape index: {}]   ;;  %s370_s1 = inlined_call_operand.vmem [shape: f32[32,64], index: 1, kind: input, shape index: {}]   ;;  %s371_s2 = inlined_call_operand.vmem [shape: f32[1,64], index: 2, kind: input, shape index: {}]   ;;  %s372_s3 = inlined_call_operand.vmem [shape: f32[64,16], index: 3, kind: input, shape index: {}]   ;;  %s373_s4 = inlined_call_operand.vmem [shape: f32[1,16], index: 4, kind: input, shape index: {}]   ;;  %s374_s5 = inlined_call_operand.hbm [shape: f32[8,16], index: 5, kind: output, shape index: {}]  }
   0x1   :  { %v25_v0 = vld [vmem:[%s370_s1 + $0x18] sm:$0xff]  ;;  %231 = vmatprep.subr.mxu0 %v286_v1  ;;  %v24_v2 = vld [vmem:[%s370_s1 + $0x10] sm:$0xff]  ;;  %239 = vmatprep.mubr.msk.f32.mxu0 %vm287_vm0, %v286_v1  ;;  %v23_v5 = vld [vmem:[%s370_s1 + $0x8] sm:$0xff] }
   0x2   :  { %v115_v3 = vld [vmem:[%s372_s3 + $0x38] sm:$0xff]  ;;  %232 = vmatpush3.msra.mxu0 %v25_v0  ;;  %242 = vmatprep.subr.mxu1 %v286_v1  ;;  %v114_v4 = vld [vmem:[%s372_s3 + $0x30] sm:$0xff] }
   0x3   :  { %233 = vmatprep.subr.mxu0 %v286_v1  ;;  %243 = vmatpush3.msra.mxu1 %v115_v3 }
   0x4   :  { %10 = vsyncpa [#allocation3], 0  ;;  %234 = vmatpush3.msra.mxu0 %v24_v2  ;;  %244 = vmatprep.subr.mxu1 %v286_v1  ;;  %v113_v6 = vld [vmem:[%s372_s3 + $0x28] sm:$0xff]  ;;  %v22_v7 = vld [vmem:[%s370_s1] sm:$0xff]  ;;  %vm33_vm1 = vcmask 261120   ;;  %vm123_vm2 = vcmask 523264  }
   0x5   :  { %235 = vmatprep.subr.mxu0 %v286_v1  ;;  %245 = vmatpush3.msra.mxu1 %v114_v4  ;;  %v21_v8 = vld [vmem:[%s369_s0] sm:$0xff]  ;;  %v111_v10 = vld [vmem:[%s372_s3 + $0x18] sm:$0xff]  ;;  %v110_v11 = vld [vmem:[%s372_s3 + $0x10] sm:$0xff]  ;;  %s288_s21 = smov [#allocation2]   ;;  %vm197_vm3 = vcmask 130048  }
   0x6   :  { %236 = vmatpush3.msra.mxu0 %v23_v5  ;;  %246 = vmatprep.subr.mxu1 %v286_v1  ;;  %v112_v9 = vld [vmem:[%s372_s3 + $0x20] sm:$0xff]  ;;  %v109_v12 = vld [vmem:[%s372_s3 + $0x8] sm:$0xff]  ;;  %s205_s22 = sshll.u32 %s288_s21, 4  ;;  %s206_s22 = int_to_ptr.vmem [resolvable:$true] %s205_s22 }
   0x7   :  { %237 = vmatprep.subr.mxu0 %v286_v1  ;;  %247 = vmatpush3.msra.mxu1 %v113_v6  ;;  %v108_v13 = vld [vmem:[%s372_s3] sm:$0xff]  ;;  %s264_s3 = scalar_lea.vmem %s206_s22, 128  ;;  %p269_p1 = scmp.lt.s32.totalorder %s206_s22, %s206_s22 }
   0x8   :  { %238 = vmatpush3.msra.mxu0 %v22_v7  ;;  %248 = vmatprep.subr.mxu1 %v286_v1  ;;  %v213_v14 = vld [vmem:[%s371_s2] ss:$0 sm:$0xff]  ;;  %p265_p0 = scmp.ne.s32.totalorder %s206_s22, %s264_s3  ;;  %p270_p2 = scmp.lt.s32.totalorder %s264_s3, %s264_s3 }
   0x9   :  { %240 = vmatmul.mubr.msk.f32.vlgmr.msra.gmra.mxu0 %vm33_vm1, %v21_v8  ;;  %249 = vmatpush3.msra.mxu1 %v112_v9  ;;  %v215_v19 = vld [vmem:[%s373_s4] ss:$0 sm:$0xff] }
   0xa   :  { %250 = vmatprep.subr.mxu1 %v286_v1  ;;  %258 = vmatprep.mubr.msk.f32.mxu1 %vm287_vm0, %v286_v1  ;;  %p271_p3 = por %p270_p2, %p269_p1 }
   0xb   :  { %251 = vmatpush3.msra.mxu1 %v111_v10 }
   0xc   :  { %252 = vmatprep.subr.mxu1 %v286_v1  ;;  %p272_p4 = pnand %p271_p3, %p265_p0 }
   0xd   :  { %253 = vmatpush3.msra.mxu1 %v110_v11 }
   0xe   :  { %254 = vmatprep.subr.mxu1 %v286_v1 }
   0xf   :  { %255 = vmatpush3.msra.mxu1 %v109_v12 }
  0x10   :  { %256 = vmatprep.subr.mxu1 %v286_v1 }
  0x11   :  { %257 = vmatpush3.msra.mxu1 %v108_v13 }
  0xc9   :  { %v103_v15 = vpop.f32.mrf.mxu0 }
  0xca   :  { %v104_v16 = vadd.f32 %v213_v14, %v103_v15 }
  0xcb   :  { %v241_v17 = vpop.f32.mrf.mxu0 }
  0xcc   :  { %v107_v18 = vmax.f32 %v104_v16, 0.0 }
  0xce   :  { %259 = vmatmul.mubr.msk.f32.vlgmr.msra.gmra.mxu1 %vm123_vm2, %v107_v18 }
 0x18e   :  { %v193_v20 = vpop.f32.mrf.mxu1 }
 0x18f   :  { %v194_v21 = vadd.f32 %v215_v19, %v193_v20 }
 0x190   :  { %v260_v22 = vpop.f32.mrf.mxu1 }
 0x191   :  { %198 = vst.msk [vmem:[#allocation2] sm:$0xff] %vm197_vm3, %v194_v21 }
 0x192   :  { %275 = shalt.err (!%p272_p4)
}
 0x193   :  { %208 = dma.vmem_to_hbm [thread:$0]  %s206_s22, 128, %s374_s5, [#allocation3]  }
 0x194   :  { %284 = dma.done.wait [#allocation3], 128  }
 0x195   :  { %285 = vsyncadd [#allocation3], 4294967168 }
 0x196   :  { %212 = vsyncpa [#allocation3], 1 }

</bundles_post_ra>
